<compile_context>
chip_gen: v5e
topology: v5e:2x2
jax: 0.10.0
libtpu: 0.0.40
codegen_flags: <defaults>
</compile_context>

<pallas_src>
import functools

import jax
import jax.numpy as jnp
from jax.experimental import pallas as pl
from jax.experimental.pallas import tpu as pltpu


HIDDEN = 256


def _round_up(x, m):
    return ((x + m - 1) // m) * m


def _pick_tb(batch):
    """Batch tile: big tiles to amortize per-step overhead, >=2 steps when possible."""
    if batch <= 256:
        return _round_up(max(batch, 8), 8)            # single block
    if batch < 512:
        return _round_up((batch + 1) // 2, 8)          # 2 steps, minimal padding
    for tb in (1024, 512, 256):
        if batch >= 2 * tb:                            # keep grid >= 2 (v7x megacore)
            return tb
    return 256


# ---------------------------------------------------------------------------
# Kernel
# ---------------------------------------------------------------------------
def _critic_kernel(state_ref, action_ref, w_s_ref, w_a_ref, w2_ref, w5_ref,
                   w3_ref, w6_ref, b_ref, q_ref):
    f32 = jnp.float32
    bf16 = jnp.bfloat16

    # Layer 1 (fused fc1|fc4), computed without assembling `sa`:
    #   h = [state|action] @ [w1|w4] + [b1|b4]
    h = jnp.dot(state_ref[...].astype(bf16), w_s_ref[...],
                preferred_element_type=f32)
    h = h + jnp.dot(action_ref[...].astype(bf16), w_a_ref[...],
                    preferred_element_type=f32)
    h = jnp.maximum(h + b_ref[0:1, :], 0.0)                     # (TB, 512) f32
    hb = h.astype(bf16)

    # Layer 2: two dense 256x256 dots (no block-diagonal structural zeros).
    # The 256-lane split of hb sits on a vreg-group boundary -> free slices.
    g1 = jnp.dot(hb[:, :HIDDEN], w2_ref[...], preferred_element_type=f32)
    g2 = jnp.dot(hb[:, HIDDEN:], w5_ref[...], preferred_element_type=f32)
    g1 = jnp.maximum(g1 + b_ref[1:2, :HIDDEN], 0.0)             # (TB, 256) f32
    g2 = jnp.maximum(g2 + b_ref[1:2, HIDDEN:], 0.0)             # (TB, 256) f32

    # Head (fc3 / fc6): zero-padded (256, 2) weights so col 0 = q1, col 1 = q2.
    q = jnp.dot(g1.astype(bf16), w3_ref[...], preferred_element_type=f32)
    q = q + jnp.dot(g2.astype(bf16), w6_ref[...], preferred_element_type=f32)
    q_ref[...] = (q + b_ref[2:3, 0:2]).astype(q_ref.dtype)      # (TB, 2)


# ---------------------------------------------------------------------------
# Wrapper
# ---------------------------------------------------------------------------
def critic_forward(state, action, packed):
    """Pallas twin-Q critic forward. Returns (q1, q2), each (B, 1) float32."""
    B, S = state.shape
    A = action.shape[1]
    w_s, w_a = packed["w_state"], packed["w_action"]
    w2, w5 = packed["w2"], packed["w5"]
    w3, w6 = packed["w3"], packed["w6"]
    b_all = packed["b_all"]

    TB = _pick_tb(B)
    B_pad = _round_up(B, TB)
    if B_pad != B:
        pad = B_pad - B
        state = jnp.pad(state, ((0, pad), (0, 0)))
        action = jnp.pad(action, ((0, pad), (0, 0)))
    grid = (B_pad // TB,)

    def _nbytes(a):
        return int(a.size) * a.dtype.itemsize

    D = S + A
    flops = 2 * B_pad * (D * 2 * HIDDEN + 2 * HIDDEN * HIDDEN + 2 * HIDDEN * 2)
    bytes_accessed = (_nbytes(state) + _nbytes(action) + _nbytes(w_s)
                      + _nbytes(w_a) + _nbytes(w2) + _nbytes(w5) + _nbytes(w3)
                      + _nbytes(w6) + _nbytes(b_all) + B_pad * 2 * 4)

    q = pl.pallas_call(
        _critic_kernel,
        out_shape=jax.ShapeDtypeStruct((B_pad, 2), jnp.float32),
        grid=grid,
        in_specs=[
            pl.BlockSpec((TB, S), lambda i: (i, 0)),       # state tile
            pl.BlockSpec((TB, A), lambda i: (i, 0)),       # action tile
            pl.BlockSpec(w_s.shape, lambda i: (0, 0)),     # weights: fetched once,
            pl.BlockSpec(w_a.shape, lambda i: (0, 0)),     # VMEM-resident across
            pl.BlockSpec(w2.shape, lambda i: (0, 0)),      # all grid steps
            pl.BlockSpec(w5.shape, lambda i: (0, 0)),
            pl.BlockSpec(w3.shape, lambda i: (0, 0)),
            pl.BlockSpec(w6.shape, lambda i: (0, 0)),
            pl.BlockSpec(b_all.shape, lambda i: (0, 0)),
        ],
        out_specs=pl.BlockSpec((TB, 2), lambda i: (i, 0)),
        compiler_params=pltpu.CompilerParams(
            dimension_semantics=("parallel",)),
        cost_estimate=pl.CostEstimate(flops=flops, transcendentals=0,
                                      bytes_accessed=bytes_accessed),
    )(state, action, w_s, w_a, w2, w5, w3, w6, b_all)

    return q[:B, 0:1], q[:B, 1:2]


# ---------------------------------------------------------------------------
# Parameter init (matches nn.Linear default U(-1/sqrt(fan_in), +...)) + packing
# ---------------------------------------------------------------------------
def init_params(key, state_dim, action_dim):
    """Weights stored as (in_features, out_features); biases as (1, out)."""
    d = state_dim + action_dim
    dims = [(d, HIDDEN), (HIDDEN, HIDDEN), (HIDDEN, 1),   # fc1..fc3
            (d, HIDDEN), (HIDDEN, HIDDEN), (HIDDEN, 1)]   # fc4..fc6
    params = {}
    for i, (fin, fout) in enumerate(dims, start=1):
        key, kw, kb = jax.random.split(key, 3)
        bound = 1.0 / (fin ** 0.5)
        params[f"w{i}"] = jax.random.uniform(
            kw, (fin, fout), jnp.float32, minval=-bound, maxval=bound)
        params[f"b{i}"] = jax.random.uniform(
            kb, (1, fout), jnp.float32, minval=-bound, maxval=bound)
    return params


def pack_params(params, state_dim, action_dim):
    """One-time packing of the 12 tensors into fused bf16 slabs (off hot path)."""
    S = state_dim
    H2 = 2 * HIDDEN
    bf16 = jnp.bfloat16

    # Layer 1: [w1 | w4] split by input row into state / action slabs.
    w14 = jnp.concatenate([params["w1"], params["w4"]], axis=1)     # (D, 512)
    w_state = w14[:S].astype(bf16)                                  # (S, 512)
    w_action = w14[S:].astype(bf16)                                 # (A, 512)

    # Layer 2: two dense (256, 256) slabs (no block-diag zero padding).
    w2 = params["w2"].astype(bf16)
    w5 = params["w5"].astype(bf16)

    # Head: zero-padded (256, 2) slabs; col 0 <- fc3, col 1 <- fc6.
    w3 = jnp.zeros((HIDDEN, 2), jnp.float32).at[:, 0:1].set(params["w3"]).astype(bf16)
    w6 = jnp.zeros((HIDDEN, 2), jnp.float32).at[:, 1:2].set(params["w6"]).astype(bf16)

    # Biases (kept f32): row0 = [b1|b4], row1 = [b2|b5], row2[0:2] = [b3,b6].
    b_all = jnp.zeros((3, H2), jnp.float32)
    b_all = b_all.at[0].set(jnp.concatenate([params["b1"][0], params["b4"][0]]))
    b_all = b_all.at[1].set(jnp.concatenate([params["b2"][0], params["b5"][0]]))
    b_all = b_all.at[2, 0].set(params["b3"][0, 0])
    b_all = b_all.at[2, 1].set(params["b6"][0, 0])

    return {"w_state": w_state, "w_action": w_action, "w2": w2, "w5": w5,
            "w3": w3, "w6": w6, "b_all": b_all}


# ---------------------------------------------------------------------------
# Pure-JAX references
# ---------------------------------------------------------------------------
_HI = jax.lax.Precision.HIGHEST


def critic_forward_ref(state, action, params):
    """Full-f32 reference (original module semantics)."""
    sa = jnp.concatenate([state, action], axis=1)

    def branch(wi, bi, wh, bh, wo, bo):
        h = jax.nn.relu(jnp.dot(sa, wi, precision=_HI) + bi)
        h = jax.nn.relu(jnp.dot(h, wh, precision=_HI) + bh)
        return jnp.dot(h, wo, precision=_HI) + bo

    q1 = branch(params["w1"], params["b1"], params["w2"], params["b2"],
                params["w3"], params["b3"])
    q2 = branch(params["w4"], params["b4"], params["w5"], params["b5"],
                params["w6"], params["b6"])
    return q1, q2


def critic_forward_ref_bf16(state, action, params):
    """Reference mirroring the kernel's bf16-operand / f32-accumulate numerics."""
    bf16, f32 = jnp.bfloat16, jnp.float32
    S = state.shape[1]

    def branch(wi, bi, wh, bh, wo, bo):
        h = (jnp.dot(state.astype(bf16), wi[:S].astype(bf16),
                     preferred_element_type=f32)
             + jnp.dot(action.astype(bf16), wi[S:].astype(bf16),
                       preferred_element_type=f32))
        h = jax.nn.relu(h + bi)
        g = jnp.dot(h.astype(bf16), wh.astype(bf16), preferred_element_type=f32)
        g = jax.nn.relu(g + bh)
        q = jnp.dot(g.astype(bf16), wo.astype(bf16), preferred_element_type=f32)
        return q + bo

    q1 = branch(params["w1"], params["b1"], params["w2"], params["b2"],
                params["w3"], params["b3"])
    q2 = branch(params["w4"], params["b4"], params["w5"], params["b5"],
                params["w6"], params["b6"])
    return q1, q2


# ---------------------------------------------------------------------------
if __name__ == "__main__":
    STATE_DIM, ACTION_DIM, BATCH = 12, 4, 8

    key = jax.random.PRNGKey(0)
    k_param, k_state, k_action = jax.random.split(key, 3)

    params = init_params(k_param, STATE_DIM, ACTION_DIM)
    packed = pack_params(params, STATE_DIM, ACTION_DIM)
    state = jax.random.normal(k_state, (BATCH, STATE_DIM), jnp.float32)
    action = jax.random.normal(k_action, (BATCH, ACTION_DIM), jnp.float32)

    q1, q2 = critic_forward(state, action, packed)
    jax.block_until_ready((q1, q2))

    q1_f32, q2_f32 = critic_forward_ref(state, action, params)
    q1_bq, q2_bq = critic_forward_ref_bf16(state, action, params)

    assert q1.shape == (BATCH, 1) and q2.shape == (BATCH, 1)
    # Tight check vs a reference using the same bf16-operand numerics.
    assert jnp.allclose(q1, q1_bq, atol=2e-3, rtol=2e-3)
    assert jnp.allclose(q2, q2_bq, atol=2e-3, rtol=2e-3)
    # Looser check vs the original full-f32 module semantics.
    assert jnp.allclose(q1, q1_f32, atol=5e-2, rtol=5e-2)
    assert jnp.allclose(q2, q2_f32, atol=5e-2, rtol=5e-2)

    # Exercise the cdiv-tiled / padded multi-step path (grid >= 2) as well.
    BATCH2 = 300
    k_s2, k_a2 = jax.random.split(jax.random.PRNGKey(1))
    state2 = jax.random.normal(k_s2, (BATCH2, STATE_DIM), jnp.float32)
    action2 = jax.random.normal(k_a2, (BATCH2, ACTION_DIM), jnp.float32)
    p1, p2 = critic_forward(state2, action2, packed)
    jax.block_until_ready((p1, p2))
    r1, r2 = critic_forward_ref_bf16(state2, action2, params)
    assert p1.shape == (BATCH2, 1) and p2.shape == (BATCH2, 1)
    assert jnp.allclose(p1, r1, atol=2e-3, rtol=2e-3)
    assert jnp.allclose(p2, r2, atol=2e-3, rtol=2e-3)

    print("KERNEL_OK")
</pallas_src>

<mosaic_0001>
module attributes {stable_mosaic.version = 11 : i64} {
  func.func @_critic_kernel(%arg0: i32, %arg1: memref<8x12xf32, #tpu.memory_space<vmem>>, %arg2: memref<8x4xf32, #tpu.memory_space<vmem>>, %arg3: memref<12x512xbf16, #tpu.memory_space<vmem>>, %arg4: memref<4x512xbf16, #tpu.memory_space<vmem>>, %arg5: memref<256x256xbf16, #tpu.memory_space<vmem>>, %arg6: memref<256x256xbf16, #tpu.memory_space<vmem>>, %arg7: memref<256x2xbf16, #tpu.memory_space<vmem>>, %arg8: memref<256x2xbf16, #tpu.memory_space<vmem>>, %arg9: memref<3x512xf32, #tpu.memory_space<vmem>>, %arg10: memref<8x2xf32, #tpu.memory_space<vmem>>) attributes {dimension_semantics = [#tpu.dimension_semantics<parallel>], iteration_bounds = array<i64: 1>, scalar_prefetch = 0 : i64, scratch_operands = 0 : i64, tpu.core_type = #tpu.core_type<tc>, window_params = [{transform_indices = @transform_0, window_bounds = array<i64: 8, 12>}, {transform_indices = @transform_1, window_bounds = array<i64: 8, 4>}, {pipeline_mode = #tpu.pipeline_mode<synchronous>, transform_indices = @transform_2, window_bounds = array<i64: 12, 512>}, {pipeline_mode = #tpu.pipeline_mode<synchronous>, transform_indices = @transform_3, window_bounds = array<i64: 4, 512>}, {pipeline_mode = #tpu.pipeline_mode<synchronous>, transform_indices = @transform_4, window_bounds = array<i64: 256, 256>}, {pipeline_mode = #tpu.pipeline_mode<synchronous>, transform_indices = @transform_5, window_bounds = array<i64: 256, 256>}, {pipeline_mode = #tpu.pipeline_mode<synchronous>, transform_indices = @transform_6, window_bounds = array<i64: 256, 2>}, {pipeline_mode = #tpu.pipeline_mode<synchronous>, transform_indices = @transform_7, window_bounds = array<i64: 256, 2>}, {pipeline_mode = #tpu.pipeline_mode<synchronous>, transform_indices = @transform_8, window_bounds = array<i64: 3, 512>}, {transform_indices = @transform_9, window_bounds = array<i64: 8, 2>}]} {
    %c0 = arith.constant 0 : index
    %c0_0 = arith.constant 0 : index
    %0 = vector.load %arg1[%c0, %c0_0] : memref<8x12xf32, #tpu.memory_space<vmem>>, vector<8x12xf32>
    %1 = arith.truncf %0 : vector<8x12xf32> to vector<8x12xbf16>
    %c0_1 = arith.constant 0 : index
    %c0_2 = arith.constant 0 : index
    %2 = vector.load %arg3[%c0_1, %c0_2] : memref<12x512xbf16, #tpu.memory_space<vmem>>, vector<12x512xbf16>
    %cst = arith.constant dense<0.000000e+00> : vector<8x512xf32>
    %3 = tpu.matmul %1, %2, %cst {dimension_numbers = #tpu.dot_dimension_numbers<[1], [0], [0], [1], [0, 0, 1, 1], [], []>} : vector<8x12xbf16>, vector<12x512xbf16>, vector<8x512xf32> -> vector<8x512xf32>
    %c0_3 = arith.constant 0 : index
    %c0_4 = arith.constant 0 : index
    %4 = vector.load %arg2[%c0_3, %c0_4] : memref<8x4xf32, #tpu.memory_space<vmem>>, vector<8x4xf32>
    %5 = arith.truncf %4 : vector<8x4xf32> to vector<8x4xbf16>
    %c0_5 = arith.constant 0 : index
    %c0_6 = arith.constant 0 : index
    %6 = vector.load %arg4[%c0_5, %c0_6] : memref<4x512xbf16, #tpu.memory_space<vmem>>, vector<4x512xbf16>
    %cst_7 = arith.constant dense<0.000000e+00> : vector<8x512xf32>
    %7 = tpu.matmul %5, %6, %cst_7 {dimension_numbers = #tpu.dot_dimension_numbers<[1], [0], [0], [1], [0, 0, 1, 1], [], []>} : vector<8x4xbf16>, vector<4x512xbf16>, vector<8x512xf32> -> vector<8x512xf32>
    %8 = arith.addf %3, %7 : vector<8x512xf32>
    %c0_8 = arith.constant 0 : index
    %c0_9 = arith.constant 0 : index
    %9 = vector.load %arg9[%c0_8, %c0_9] : memref<3x512xf32, #tpu.memory_space<vmem>>, vector<1x512xf32>
    %10 = vector.broadcast %9 : vector<1x512xf32> to vector<8x512xf32>
    %11 = arith.addf %8, %10 : vector<8x512xf32>
    %cst_10 = arith.constant 0.000000e+00 : f32
    %12 = vector.broadcast %cst_10 : f32 to vector<8x512xf32>
    %13 = arith.maximumf %11, %12 : vector<8x512xf32>
    %14 = arith.truncf %13 : vector<8x512xf32> to vector<8x512xbf16>
    %15 = vector.extract_strided_slice %14 {offsets = [0, 0], sizes = [8, 256], strides = [1, 1]} : vector<8x512xbf16> to vector<8x256xbf16>
    %c0_11 = arith.constant 0 : index
    %c0_12 = arith.constant 0 : index
    %16 = vector.load %arg5[%c0_11, %c0_12] : memref<256x256xbf16, #tpu.memory_space<vmem>>, vector<256x256xbf16>
    %cst_13 = arith.constant dense<0.000000e+00> : vector<8x256xf32>
    %17 = tpu.matmul %15, %16, %cst_13 {dimension_numbers = #tpu.dot_dimension_numbers<[1], [0], [0], [1], [0, 0, 1, 1], [], []>} : vector<8x256xbf16>, vector<256x256xbf16>, vector<8x256xf32> -> vector<8x256xf32>
    %18 = vector.extract_strided_slice %14 {offsets = [0, 256], sizes = [8, 256], strides = [1, 1]} : vector<8x512xbf16> to vector<8x256xbf16>
    %c0_14 = arith.constant 0 : index
    %c0_15 = arith.constant 0 : index
    %19 = vector.load %arg6[%c0_14, %c0_15] : memref<256x256xbf16, #tpu.memory_space<vmem>>, vector<256x256xbf16>
    %cst_16 = arith.constant dense<0.000000e+00> : vector<8x256xf32>
    %20 = tpu.matmul %18, %19, %cst_16 {dimension_numbers = #tpu.dot_dimension_numbers<[1], [0], [0], [1], [0, 0, 1, 1], [], []>} : vector<8x256xbf16>, vector<256x256xbf16>, vector<8x256xf32> -> vector<8x256xf32>
    %c1 = arith.constant 1 : index
    %c0_17 = arith.constant 0 : index
    %21 = vector.load %arg9[%c1, %c0_17] : memref<3x512xf32, #tpu.memory_space<vmem>>, vector<1x256xf32>
    %22 = vector.broadcast %21 : vector<1x256xf32> to vector<8x256xf32>
    %23 = arith.addf %17, %22 : vector<8x256xf32>
    %cst_18 = arith.constant 0.000000e+00 : f32
    %24 = vector.broadcast %cst_18 : f32 to vector<8x256xf32>
    %25 = arith.maximumf %23, %24 : vector<8x256xf32>
    %c1_19 = arith.constant 1 : index
    %c256 = arith.constant 256 : index
    %26 = vector.load %arg9[%c1_19, %c256] : memref<3x512xf32, #tpu.memory_space<vmem>>, vector<1x256xf32>
    %27 = vector.broadcast %26 : vector<1x256xf32> to vector<8x256xf32>
    %28 = arith.addf %20, %27 : vector<8x256xf32>
    %cst_20 = arith.constant 0.000000e+00 : f32
    %29 = vector.broadcast %cst_20 : f32 to vector<8x256xf32>
    %30 = arith.maximumf %28, %29 : vector<8x256xf32>
    %31 = arith.truncf %25 : vector<8x256xf32> to vector<8x256xbf16>
    %c0_21 = arith.constant 0 : index
    %c0_22 = arith.constant 0 : index
    %32 = vector.load %arg7[%c0_21, %c0_22] : memref<256x2xbf16, #tpu.memory_space<vmem>>, vector<256x2xbf16>
    %cst_23 = arith.constant dense<0.000000e+00> : vector<8x2xf32>
    %33 = tpu.matmul %31, %32, %cst_23 {dimension_numbers = #tpu.dot_dimension_numbers<[1], [0], [0], [1], [0, 0, 1, 1], [], []>} : vector<8x256xbf16>, vector<256x2xbf16>, vector<8x2xf32> -> vector<8x2xf32>
    %34 = arith.truncf %30 : vector<8x256xf32> to vector<8x256xbf16>
    %c0_24 = arith.constant 0 : index
    %c0_25 = arith.constant 0 : index
    %35 = vector.load %arg8[%c0_24, %c0_25] : memref<256x2xbf16, #tpu.memory_space<vmem>>, vector<256x2xbf16>
    %cst_26 = arith.constant dense<0.000000e+00> : vector<8x2xf32>
    %36 = tpu.matmul %34, %35, %cst_26 {dimension_numbers = #tpu.dot_dimension_numbers<[1], [0], [0], [1], [0, 0, 1, 1], [], []>} : vector<8x256xbf16>, vector<256x2xbf16>, vector<8x2xf32> -> vector<8x2xf32>
    %37 = arith.addf %33, %36 : vector<8x2xf32>
    %c2 = arith.constant 2 : index
    %c0_27 = arith.constant 0 : index
    %38 = vector.load %arg9[%c2, %c0_27] : memref<3x512xf32, #tpu.memory_space<vmem>>, vector<1x2xf32>
    %39 = vector.broadcast %38 : vector<1x2xf32> to vector<8x2xf32>
    %40 = arith.addf %37, %39 : vector<8x2xf32>
    %c0_28 = arith.constant 0 : index
    %c0_29 = arith.constant 0 : index
    %41 = vector.load %arg10[%c0_28, %c0_29] : memref<8x2xf32, #tpu.memory_space<vmem>>, vector<8x2xf32>
    tpu.vector_store %arg10[%c0_28, %c0_29], %40 {strides = array<i32>} : memref<8x2xf32, #tpu.memory_space<vmem>>, vector<8x2xf32>,
    return
  }
  func.func @transform_0(%arg0: i32) -> (i32, i32) {
    %c0_i32 = arith.constant 0 : i32
    %c0_i32_0 = arith.constant 0 : i32
    return %arg0, %c0_i32 : i32, i32
  }
  func.func @transform_1(%arg0: i32) -> (i32, i32) {
    %c0_i32 = arith.constant 0 : i32
    %c0_i32_0 = arith.constant 0 : i32
    return %arg0, %c0_i32 : i32, i32
  }
  func.func @transform_2(%arg0: i32) -> (i32, i32) {
    %c0_i32 = arith.constant 0 : i32
    %c0_i32_0 = arith.constant 0 : i32
    %c0_i32_1 = arith.constant 0 : i32
    return %c0_i32, %c0_i32_0 : i32, i32
  }
  func.func @transform_3(%arg0: i32) -> (i32, i32) {
    %c0_i32 = arith.constant 0 : i32
    %c0_i32_0 = arith.constant 0 : i32
    %c0_i32_1 = arith.constant 0 : i32
    return %c0_i32, %c0_i32_0 : i32, i32
  }
  func.func @transform_4(%arg0: i32) -> (i32, i32) {
    %c0_i32 = arith.constant 0 : i32
    %c0_i32_0 = arith.constant 0 : i32
    %c0_i32_1 = arith.constant 0 : i32
    return %c0_i32, %c0_i32_0 : i32, i32
  }
  func.func @transform_5(%arg0: i32) -> (i32, i32) {
    %c0_i32 = arith.constant 0 : i32
    %c0_i32_0 = arith.constant 0 : i32
    %c0_i32_1 = arith.constant 0 : i32
    return %c0_i32, %c0_i32_0 : i32, i32
  }
  func.func @transform_6(%arg0: i32) -> (i32, i32) {
    %c0_i32 = arith.constant 0 : i32
    %c0_i32_0 = arith.constant 0 : i32
    %c0_i32_1 = arith.constant 0 : i32
    return %c0_i32, %c0_i32_0 : i32, i32
  }
  func.func @transform_7(%arg0: i32) -> (i32, i32) {
    %c0_i32 = arith.constant 0 : i32
    %c0_i32_0 = arith.constant 0 : i32
    %c0_i32_1 = arith.constant 0 : i32
    return %c0_i32, %c0_i32_0 : i32, i32
  }
  func.func @transform_8(%arg0: i32) -> (i32, i32) {
    %c0_i32 = arith.constant 0 : i32
    %c0_i32_0 = arith.constant 0 : i32
    %c0_i32_1 = arith.constant 0 : i32
    return %c0_i32, %c0_i32_0 : i32, i32
  }
  func.func @transform_9(%arg0: i32) -> (i32, i32) {
    %c0_i32 = arith.constant 0 : i32
    %c0_i32_0 = arith.constant 0 : i32
    return %arg0, %c0_i32 : i32, i32
  }
}

</mosaic_0001>

<bundles_post_ra>
// kernel: tpu_custom_call.1
= control target key start
LH: loop header
LB: loop body
LE: loop exit
PB: predicated region body
PF: predicated region fallthrough
CT: control target
= control target key end

     0   :  { %14 = vsyncpa [#allocation3], 0  ;;  %s2136_s0 = inlined_call_operand.hbm [shape: f32[8,12], index: 0, kind: input, shape index: {}]   ;;  %s2137_s1 = inlined_call_operand.vmem [shape: f32[8,4], index: 1, kind: input, shape index: {}]   ;;  %s2138_s2 = inlined_call_operand.hbm [shape: bf16[12,512], index: 2, kind: input, shape index: {}]   ;;  %s2139_s3 = inlined_call_operand.hbm [shape: bf16[4,512], index: 3, kind: input, shape index: {}]   ;;  %s2140_s4 = inlined_call_operand.vmem [shape: bf16[256,256], index: 4, kind: input, shape index: {}]   ;;  %s2141_s5 = inlined_call_operand.hbm [shape: bf16[256,256], index: 5, kind: input, shape index: {}]   ;;  %s2142_s6 = inlined_call_operand.vmem [shape: bf16[256,2], index: 6, kind: input, shape index: {}]   ;;  %s2143_s7 = inlined_call_operand.vmem [shape: bf16[256,2], index: 7, kind: input, shape index: {}]   ;;  %s2144_s8 = inlined_call_operand.vmem [shape: f32[3,512], index: 8, kind: input, shape index: {}]   ;;  %s2145_s9 = inlined_call_operand.vmem [shape: f32[8,2], index: 9, kind: output, shape index: {}]  }
   0x1   :  { %15 = vsyncpa [#allocation5], 0  ;;  %s34_s11 = sshll.u32 %s2138_s2, 4  ;;  %s35_s11 = int_to_ptr.hbm [resolvable:$true] %s34_s11 }
   0x2   :  { %16 = vsyncpa [#allocation8], 0  ;;  %s1742_s12 = smov [#allocation4]   ;;  %s22_s16 = sshll.u32 %s2136_s0, 4  ;;  %s23_s16 = int_to_ptr.hbm [resolvable:$true] %s22_s16 }
   0x3   :  { %s36_s13 = sshll.u32 %s1742_s12, 4  ;;  %s1743_s17 = smov 256   ;;  %s37_s13 = int_to_ptr.vmem [resolvable:$true] %s36_s13 }
   0x4   :  { %s1744_s18 = smov 16   ;;  %s1745_s19 = smov [#allocation2]  }
   0x5   :  { %42 = dma.hbm_to_vmem [thread:$0]  %s35_s11, 512, %s37_s13, [#allocation5], %s1743_s17, %s1743_s17, %s1744_s18  }
   0x6   :  { %s24_s20 = sshll.u32 %s1745_s19, 4  ;;  %s48_s23 = sshll.u32 %s2139_s3, 4  ;;  %s25_s20 = int_to_ptr.vmem [resolvable:$true] %s24_s20  ;;  %s49_s23 = int_to_ptr.hbm [resolvable:$true] %s48_s23 }
   0x7   :  { %27 = dma.hbm_to_vmem [thread:$0]  %s23_s16, 128, %s25_s20, [#allocation3]  }
   0x8   :  { %s60_s25 = sshll.u32 %s2141_s5, 4  ;;  %s1746_s26 = smov [#allocation6]   ;;  %s61_s25 = int_to_ptr.hbm [resolvable:$true] %s60_s25 }
   0x9   :  { %s50_s27 = sshll.u32 %s1746_s26, 4  ;;  %s1747_s0 = smov [#allocation7]   ;;  %s51_s27 = int_to_ptr.vmem [resolvable:$true] %s50_s27 }
   0xa   :  { %53 = dma.hbm_to_vmem [thread:$0]  %s49_s23, 128, %s51_s27, [#allocation5]  }
   0xb   :  { %s62_s28 = sshll.u32 %s1747_s0, 4  ;;  %s1748_s29 = smov 128   ;;  %s63_s28 = int_to_ptr.vmem [resolvable:$true] %s62_s28 }
   0xc   :  { %s1749_s30 = smov 8  }
   0xd   :  { %68 = dma.hbm_to_vmem [thread:$0]  %s61_s25, 4096, %s63_s28, [#allocation8], %s1748_s29, %s1748_s29, %s1749_s30  }
   0xe   :  { %1736 = dma.done.wait [#allocation3], 128  }
   0xf   :  { %1737 = vsyncadd [#allocation3], 4294967168 }
  0x10   :  { %1738 = dma.done.wait [#allocation5], 640  }
  0x11   :  { %1739 = vsyncadd [#allocation5], 4294966656 }
  0x12   :  { %1740 = dma.done.wait [#allocation8], 4096  }
  0x13   :  { %1741 = vsyncadd [#allocation8], 4294963200  ;;  %v100_v0 = vld [vmem:[#allocation6] sm:$0xff]  ;;  %v1533_v2 = vld [vmem:[#allocation4 + $0xc] sm:$0x30]  ;;  %vm192_vm0 = vcmask 1045504  }
  0x14   :  { %v1127_v1 = vld [vmem:[#allocation4] sm:$0xf]  ;;  %102 = vst [vmem:[#allocation1] ss:$4 sm:$0xff] %v100_v0  ;;  %v1531_v4 = vld [vmem:[#allocation4 + $0x4] sm:$0xf] }
  0x15   :  { %v1128_v3 = vor.u32 %v1533_v2, %v1127_v1  ;;  %v1129_v5 = vld [vmem:[#allocation4 + $0x10] sm:$0x30]  ;;  %v1532_v6 = vld [vmem:[#allocation4 + $0xc] sm:$0xf]  ;;  %v1137_v7 = vld [vmem:[#allocation4 + $0x18] sm:$0x30] }
  0x16   :  { %v1132_v8 = vor.u32 %v1531_v4, %v1129_v5  ;;  %v1135_v9 = vld [vmem:[#allocation4 + $0x8] sm:$0xf]  ;;  %v1534_v10 = vld [vmem:[#allocation4 + $0x14] sm:$0x30]  ;;  %vm111_vm1 = vcmask 1041408   ;;  %v98_v11 = vld [vmem:[%s2137_s1] sm:$0xff]  ;;  %v1140_v13 = vor.u32 %v1532_v6, %v1137_v7 }
  0x17   :  { %vm107_vm2 = vcmask 31744   ;;  %v194_v12 = vsel %vm192_vm0, %v1128_v3, 0  ;;  %v1204_v14 = vld [vmem:[%s2140_s4 + $0x70] sm:$0xf]  ;;  %v1550_v15 = vld [vmem:[%s2140_s4 + $0x74] sm:$0xf0]  ;;  %v1136_v20 = vor.u32 %v1534_v10, %v1135_v9  ;;  %v99_v27 = vpack.c.bf16 %v98_v11, %v98_v11 }
  0x18   :  { %v1268_v16 = vld [vmem:[%s2140_s4 + $0xf0] sm:$0xf]  ;;  %v1566_v17 = vld [vmem:[%s2140_s4 + $0xf4] sm:$0xf0]  ;;  %v1549_v21 = vld [vmem:[%s2140_s4 + $0x74] sm:$0xf]  ;;  %v1205_v35 = vor.u32 %v1550_v15, %v1204_v14 }
  0x19   :  { %v1206_v22 = vld [vmem:[%s2140_s4 + $0x78] sm:$0xf0]  ;;  %v1565_v23 = vld [vmem:[%s2140_s4 + $0xf4] sm:$0xf]  ;;  %v197_v28 = vsel %vm192_vm0, %v1132_v8, 0  ;;  %v203_v33 = vsel %vm192_vm0, %v1140_v13, 0  ;;  %v1269_v36 = vor.u32 %v1566_v17, %v1268_v16 }
  0x1a   :  { %v1270_v31 = vld [vmem:[%s2140_s4 + $0xf8] sm:$0xf0]  ;;  %v200_v34 = vsel %vm192_vm0, %v1136_v20, 0  ;;  %v1196_v37 = vld [vmem:[%s2140_s4 + $0x60] sm:$0xf]  ;;  %v1209_v39 = vor.u32 %v1549_v21, %v1206_v22  ;;  %v92_v3 = vld [vmem:[#allocation2] sm:$0xff] }
  0x1b   :  { %v103_v18 = vld.sshfl [vmem:[#allocation1] sm:$0xff pattern:$0x73625140]  ;;  %v104_v19 = vld.sshfl [vmem:[#allocation1 + $0x8] sm:$0xff pattern:$0x73625140]  ;;  %v1273_v40 = vor.u32 %v1565_v23, %v1270_v31  ;;  %v93_v10 = vpack.c.bf16 %v92_v3, %v92_v3 }
  0x1c   :  { %v112_v24 = vsel %vm111_vm1, %v103_v18, 0  ;;  %v114_v25 = vsel %vm111_vm1, %v104_v19, 0  ;;  %v105_v26 = vld.sshfl [vmem:[#allocation1 + $0x10] sm:$0xff pattern:$0x73625140]  ;;  %vm188_vm3 = vcmask 97280  }
  0x1d   :  { %127 = vmatpush.bf16.msra.mxu0 %v112_v24  ;;  %140 = vmatpush.bf16.msra.mxu1 %v114_v25  ;;  %v116_v29 = vsel %vm111_vm1, %v105_v26, 0  ;;  %v106_v30 = vld.sshfl [vmem:[#allocation1 + $0x18] sm:$0xff pattern:$0x73625140]  ;;  %v1548_v38 = vld [vmem:[%s2140_s4 + $0x64] sm:$0xf0] }
  0x1e   :  { %153 = vmatpush.bf16.msra.mxu2 %v116_v29  ;;  %v118_v32 = vsel %vm111_vm1, %v106_v30, 0  ;;  %v1260_v41 = vld [vmem:[%s2140_s4 + $0xe0] sm:$0xf]  ;;  %v1564_v42 = vld [vmem:[%s2140_s4 + $0xe4] sm:$0xf0]  ;;  %v1197_v47 = vor.u32 %v1548_v38, %v1196_v37  ;;  %vm1112_vm4 = vcmask 15360  }
  0x1f   :  { %166 = vmatpush.bf16.msra.mxu3 %v118_v32  ;;  %v1547_v43 = vld [vmem:[%s2140_s4 + $0x64] sm:$0xf]  ;;  %v1198_v44 = vld [vmem:[%s2140_s4 + $0x68] sm:$0xf0]  ;;  %v1261_v48 = vor.u32 %v1564_v42, %v1260_v41  ;;  %v1188_v49 = vld [vmem:[%s2140_s4 + $0x50] sm:$0xf] }
  0x20   :  { %1121 = vmatmul.msk.bf16.vlgmr.msra.gmra.mxu0 %vm107_vm2, %v99_v27  ;;  %1122 = vmatmul.msk.bf16.vlgmr.msra.gmra.mxu1 %vm107_vm2, %v99_v27  ;;  %v1563_v45 = vld [vmem:[%s2140_s4 + $0xe4] sm:$0xf]  ;;  %v1262_v46 = vld [vmem:[%s2140_s4 + $0xe8] sm:$0xf0]  ;;  %v1546_v50 = vld [vmem:[%s2140_s4 + $0x54] sm:$0xf0]  ;;  %v1201_v52 = vor.u32 %v1547_v43, %v1198_v44 }
  0x21   :  { %212 = vmatpush.bf16.msrb.mxu0 %v194_v12  ;;  %225 = vmatpush.bf16.msrb.mxu1 %v197_v28  ;;  %v1252_v51 = vld [vmem:[%s2140_s4 + $0xd0] sm:$0xf]  ;;  %v1265_v53 = vor.u32 %v1563_v45, %v1262_v46  ;;  %v1562_v54 = vld [vmem:[%s2140_s4 + $0xd4] sm:$0xf0]  ;;  %v1545_v55 = vld [vmem:[%s2140_s4 + $0x54] sm:$0xf]  ;;  %v1189_v59 = vor.u32 %v1546_v50, %v1188_v49 }
  0x22   :  { %1123 = vmatmul.msk.bf16.vlgmr.msra.gmra.mxu2 %vm107_vm2, %v99_v27  ;;  %1124 = vmatmul.msk.bf16.vlgmr.msra.gmra.mxu3 %vm107_vm2, %v99_v27  ;;  %v1190_v56 = vld [vmem:[%s2140_s4 + $0x58] sm:$0xf0]  ;;  %v1561_v57 = vld [vmem:[%s2140_s4 + $0xd4] sm:$0xf]  ;;  %v1253_v60 = vor.u32 %v1562_v54, %v1252_v51  ;;  %v1180_v61 = vld [vmem:[%s2140_s4 + $0x40] sm:$0xf] }
  0x23   :  { %251 = vmatpush.bf16.msrb.mxu3 %v203_v33  ;;  %238 = vmatpush.bf16.msrb.mxu2 %v200_v34  ;;  %v1254_v58 = vld [vmem:[%s2140_s4 + $0xd8] sm:$0xf0]  ;;  %v1193_v62 = vor.u32 %v1545_v55, %v1190_v56  ;;  %v1544_v0 = vld [vmem:[%s2140_s4 + $0x44] sm:$0xf0]  ;;  %v1244_v1 = vld [vmem:[%s2140_s4 + $0xc0] sm:$0xf] }
  0x24   :  { %v1257_v63 = vor.u32 %v1561_v57, %v1254_v58  ;;  %v1560_v2 = vld [vmem:[%s2140_s4 + $0xc4] sm:$0xf0]  ;;  %v1559_v4 = vld [vmem:[%s2140_s4 + $0xc4] sm:$0xf]  ;;  %v1246_v5 = vld [vmem:[%s2140_s4 + $0xc8] sm:$0xf0]  ;;  %v1181_v6 = vor.u32 %v1544_v0, %v1180_v61 }
  0x25   :  { %515 = vmatpush.bf16.msra.mxu0 %v1205_v35  ;;  %528 = vmatpush.bf16.msra.mxu1 %v1269_v36  ;;  %v1245_v7 = vor.u32 %v1560_v2, %v1244_v1  ;;  %v1543_v8 = vld [vmem:[%s2140_s4 + $0x44] sm:$0xf]  ;;  %v1182_v9 = vld [vmem:[%s2140_s4 + $0x48] sm:$0xf0]  ;;  %v1249_v11 = vor.u32 %v1559_v4, %v1246_v5  ;;  %v1172_v13 = vld [vmem:[%s2140_s4 + $0x30] sm:$0xf] }
  0x26   :  { %v1185_v12 = vor.u32 %v1543_v8, %v1182_v9  ;;  %v1542_v14 = vld [vmem:[%s2140_s4 + $0x34] sm:$0xf0]  ;;  %v1236_v15 = vld [vmem:[%s2140_s4 + $0xb0] sm:$0xf]  ;;  %v1541_v18 = vld [vmem:[%s2140_s4 + $0x34] sm:$0xf] }
  0x27   :  { %541 = vmatpush.bf16.msra.mxu2 %v1209_v39  ;;  %554 = vmatpush.bf16.msra.mxu3 %v1273_v40  ;;  %v1173_v16 = vor.u32 %v1542_v14, %v1172_v13  ;;  %v1558_v17 = vld [vmem:[%s2140_s4 + $0xb4] sm:$0xf0]  ;;  %v1174_v19 = vld [vmem:[%s2140_s4 + $0x38] sm:$0xf0]  ;;  %v1557_v22 = vld [vmem:[%s2140_s4 + $0xb4] sm:$0xf] }
  0x28   :  { %v1237_v20 = vor.u32 %v1558_v17, %v1236_v15  ;;  %v1177_v21 = vor.u32 %v1541_v18, %v1174_v19  ;;  %v1238_v23 = vld [vmem:[%s2140_s4 + $0xb8] sm:$0xf0]  ;;  %v1164_v24 = vld [vmem:[%s2140_s4 + $0x20] sm:$0xf]  ;;  %v1540_v26 = vld [vmem:[%s2140_s4 + $0x24] sm:$0xf0] }
  0x29   :  { %516 = vmatpush.bf16.msra.mxu0 %v1197_v47  ;;  %529 = vmatpush.bf16.msra.mxu1 %v1261_v48  ;;  %v1241_v25 = vor.u32 %v1557_v22, %v1238_v23  ;;  %v1228_v27 = vld [vmem:[%s2140_s4 + $0xa0] sm:$0xf]  ;;  %v1556_v28 = vld [vmem:[%s2140_s4 + $0xa4] sm:$0xf0]  ;;  %v1165_v29 = vor.u32 %v1540_v26, %v1164_v24  ;;  %v1539_v31 = vld [vmem:[%s2140_s4 + $0x24] sm:$0xf] }
  0x2a   :  { %v1229_v30 = vor.u32 %v1556_v28, %v1228_v27  ;;  %v1166_v32 = vld [vmem:[%s2140_s4 + $0x28] sm:$0xf0]  ;;  %v1555_v33 = vld [vmem:[%s2140_s4 + $0xa4] sm:$0xf]  ;;  %v1156_v37 = vld [vmem:[%s2140_s4 + $0x10] sm:$0xf] }
  0x2b   :  { %542 = vmatpush.bf16.msra.mxu2 %v1201_v52  ;;  %555 = vmatpush.bf16.msra.mxu3 %v1265_v53  ;;  %v1169_v34 = vor.u32 %v1539_v31, %v1166_v32  ;;  %v1230_v35 = vld [vmem:[%s2140_s4 + $0xa8] sm:$0xf0]  ;;  %v1538_v38 = vld [vmem:[%s2140_s4 + $0x14] sm:$0xf0]  ;;  %v1220_v39 = vld [vmem:[%s2140_s4 + $0x90] sm:$0xf] }
  0x2c   :  { %v1233_v36 = vor.u32 %v1555_v33, %v1230_v35  ;;  %v1157_v40 = vor.u32 %v1538_v38, %v1156_v37  ;;  %v1554_v41 = vld [vmem:[%s2140_s4 + $0x94] sm:$0xf0]  ;;  %v1537_v42 = vld [vmem:[%s2140_s4 + $0x14] sm:$0xf]  ;;  %v1158_v43 = vld [vmem:[%s2140_s4 + $0x18] sm:$0xf0] }
  0x2d   :  { %517 = vmatpush.bf16.msra.mxu0 %v1189_v59  ;;  %530 = vmatpush.bf16.msra.mxu1 %v1253_v60  ;;  %v1221_v44 = vor.u32 %v1554_v41, %v1220_v39  ;;  %v1161_v45 = vor.u32 %v1537_v42, %v1158_v43  ;;  %v1553_v46 = vld [vmem:[%s2140_s4 + $0x94] sm:$0xf]  ;;  %v1222_v47 = vld [vmem:[%s2140_s4 + $0x98] sm:$0xf0]  ;;  %v1148_v48 = vld [vmem:[%s2140_s4] sm:$0xf] }
  0x2e   :  { %v1225_v49 = vor.u32 %v1553_v46, %v1222_v47  ;;  %v1536_v50 = vld [vmem:[%s2140_s4 + $0x4] sm:$0xf0]  ;;  %v1212_v51 = vld [vmem:[%s2140_s4 + $0x80] sm:$0xf]  ;;  %v1535_v55 = vld [vmem:[%s2140_s4 + $0x4] sm:$0xf] }
  0x2f   :  { %543 = vmatpush.bf16.msra.mxu2 %v1193_v62  ;;  %556 = vmatpush.bf16.msra.mxu3 %v1257_v63  ;;  %v1552_v52 = vld [vmem:[%s2140_s4 + $0x84] sm:$0xf0]  ;;  %v1149_v53 = vor.u32 %v1536_v50, %v1148_v48  ;;  %v1150_v56 = vld [vmem:[%s2140_s4 + $0x8] sm:$0xf0]  ;;  %v1551_v57 = vld [vmem:[%s2140_s4 + $0x84] sm:$0xf] }
  0x30   :  { %1141 = vmatmul.msk.bf16.vlgmr.msrb.gmra.mxu0 %vm188_vm3, %v93_v10  ;;  %1142 = vmatmul.msk.bf16.vlgmr.msrb.gmra.mxu1 %vm188_vm3, %v93_v10  ;;  %v1213_v54 = vor.u32 %v1552_v52, %v1212_v51  ;;  %v1153_v58 = vor.u32 %v1535_v55, %v1150_v56  ;;  %v1214_v59 = vld [vmem:[%s2140_s4 + $0x88] sm:$0xf0]  ;;  %v1333_v60 = vld [vmem:[#allocation7 + $0x70] sm:$0xf]  ;;  %v1582_v61 = vld [vmem:[#allocation7 + $0x74] sm:$0xf0] }
  0x31   :  { %518 = vmatpush.bf16.msra.mxu0 %v1181_v6  ;;  %531 = vmatpush.bf16.msra.mxu1 %v1245_v7  ;;  %v1217_v62 = vor.u32 %v1551_v57, %v1214_v59  ;;  %v1334_v63 = vor.u32 %v1582_v61, %v1333_v60  ;;  %v1397_v0 = vld [vmem:[#allocation7 + $0xf0] sm:$0xf]  ;;  %v1598_v1 = vld [vmem:[#allocation7 + $0xf4] sm:$0xf0]  ;;  %v1581_v2 = vld [vmem:[#allocation7 + $0x74] sm:$0xf] }
  0x32   :  { %1143 = vmatmul.msk.bf16.vlgmr.msrb.gmra.mxu2 %vm188_vm3, %v93_v10  ;;  %1144 = vmatmul.msk.bf16.vlgmr.msrb.gmra.mxu3 %vm188_vm3, %v93_v10  ;;  %v1398_v3 = vor.u32 %v1598_v1, %v1397_v0  ;;  %v1335_v4 = vld [vmem:[#allocation7 + $0x78] sm:$0xf0]  ;;  %v1597_v5 = vld [vmem:[#allocation7 + $0xf4] sm:$0xf]  ;;  %v1325_v9 = vld [vmem:[#allocation7 + $0x60] sm:$0xf] }
  0x33   :  { %557 = vmatpush.bf16.msra.mxu3 %v1249_v11  ;;  %544 = vmatpush.bf16.msra.mxu2 %v1185_v12  ;;  %v1399_v6 = vld [vmem:[#allocation7 + $0xf8] sm:$0xf0]  ;;  %v1338_v7 = vor.u32 %v1581_v2, %v1335_v4  ;;  %v1580_v10 = vld [vmem:[#allocation7 + $0x64] sm:$0xf0]  ;;  %v1389_v11 = vld [vmem:[#allocation7 + $0xe0] sm:$0xf] }
  0x34   :  { %v1402_v8 = vor.u32 %v1597_v5, %v1399_v6  ;;  %v1326_v12 = vor.u32 %v1580_v10, %v1325_v9  ;;  %v1596_v13 = vld [vmem:[#allocation7 + $0xe4] sm:$0xf0]  ;;  %v1579_v14 = vld [vmem:[#allocation7 + $0x64] sm:$0xf]  ;;  %v1391_v18 = vld [vmem:[#allocation7 + $0xe8] sm:$0xf0] }
  0x35   :  { %519 = vmatpush.bf16.msra.mxu0 %v1173_v16  ;;  %532 = vmatpush.bf16.msra.mxu1 %v1237_v20  ;;  %v1390_v15 = vor.u32 %v1596_v13, %v1389_v11  ;;  %v1327_v16 = vld [vmem:[#allocation7 + $0x68] sm:$0xf0]  ;;  %v1595_v17 = vld [vmem:[#allocation7 + $0xe4] sm:$0xf]  ;;  %v1578_v22 = vld [vmem:[#allocation7 + $0x54] sm:$0xf0] }
  0x36   :  { %v1330_v19 = vor.u32 %v1579_v14, %v1327_v16  ;;  %v1394_v20 = vor.u32 %v1595_v17, %v1391_v18  ;;  %v1381_v23 = vld [vmem:[#allocation7 + $0xd0] sm:$0xf]  ;;  %v1577_v26 = vld [vmem:[#allocation7 + $0x54] sm:$0xf]  ;;  %v1319_v27 = vld [vmem:[#allocation7 + $0x58] sm:$0xf0] }
  0x37   :  { %545 = vmatpush.bf16.msra.mxu2 %v1177_v21  ;;  %558 = vmatpush.bf16.msra.mxu3 %v1241_v25  ;;  %v1317_v21 = vld [vmem:[#allocation7 + $0x50] sm:$0xf]  ;;  %v1594_v25 = vld [vmem:[#allocation7 + $0xd4] sm:$0xf0]  ;;  %v1383_v31 = vld [vmem:[#allocation7 + $0xd8] sm:$0xf0] }
  0x38   :  { %v1318_v24 = vor.u32 %v1578_v22, %v1317_v21  ;;  %v1382_v28 = vor.u32 %v1594_v25, %v1381_v23  ;;  %v1309_v33 = vld [vmem:[#allocation7 + $0x40] sm:$0xf]  ;;  %v1592_v37 = vld [vmem:[#allocation7 + $0xc4] sm:$0xf0]  ;;  %v1575_v38 = vld [vmem:[#allocation7 + $0x44] sm:$0xf] }
  0x39   :  { %520 = vmatpush.bf16.msra.mxu0 %v1165_v29  ;;  %533 = vmatpush.bf16.msra.mxu1 %v1229_v30  ;;  %v1322_v29 = vor.u32 %v1577_v26, %v1319_v27  ;;  %v1593_v30 = vld [vmem:[#allocation7 + $0xd4] sm:$0xf]  ;;  %v1591_v41 = vld [vmem:[#allocation7 + $0xc4] sm:$0xf]  ;;  %v1375_v42 = vld [vmem:[#allocation7 + $0xc8] sm:$0xf0] }
  0x3a   :  { %v1386_v32 = vor.u32 %v1593_v30, %v1383_v31  ;;  %v1574_v46 = vld [vmem:[#allocation7 + $0x34] sm:$0xf0]  ;;  %v1365_v47 = vld [vmem:[#allocation7 + $0xb0] sm:$0xf]  ;;  %v1573_v50 = vld [vmem:[#allocation7 + $0x34] sm:$0xf] }
  0x3b   :  { %546 = vmatpush.bf16.msra.mxu2 %v1169_v34  ;;  %559 = vmatpush.bf16.msra.mxu3 %v1233_v36  ;;  %v1576_v34 = vld [vmem:[#allocation7 + $0x44] sm:$0xf0]  ;;  %v1373_v36 = vld [vmem:[#allocation7 + $0xc0] sm:$0xf]  ;;  %v1303_v51 = vld [vmem:[#allocation7 + $0x38] sm:$0xf0] }
  0x3c   :  { %v1310_v35 = vor.u32 %v1576_v34, %v1309_v33  ;;  %v1374_v39 = vor.u32 %v1592_v37, %v1373_v36  ;;  %v1367_v55 = vld [vmem:[#allocation7 + $0xb8] sm:$0xf0]  ;;  %v1293_v59 = vld [vmem:[#allocation7 + $0x20] sm:$0xf]  ;;  %v1572_v60 = vld [vmem:[#allocation7 + $0x24] sm:$0xf0] }
  0x3d   :  { %521 = vmatpush.bf16.msra.mxu0 %v1157_v40  ;;  %534 = vmatpush.bf16.msra.mxu1 %v1221_v44  ;;  %v1311_v40 = vld [vmem:[#allocation7 + $0x48] sm:$0xf0]  ;;  %v1378_v44 = vor.u32 %v1591_v41, %v1375_v42  ;;  %v1357_v61 = vld [vmem:[#allocation7 + $0xa0] sm:$0xf]  ;;  %v1571_v0 = vld [vmem:[#allocation7 + $0x24] sm:$0xf] }
  0x3e   :  { %v1314_v43 = vor.u32 %v1575_v38, %v1311_v40  ;;  %v1295_v1 = vld [vmem:[#allocation7 + $0x28] sm:$0xf0]  ;;  %v1587_v4 = vld [vmem:[#allocation7 + $0xa4] sm:$0xf]  ;;  %v1285_v6 = vld [vmem:[#allocation7 + $0x10] sm:$0xf] }
  0x3f   :  { %547 = vmatpush.bf16.msra.mxu2 %v1161_v45  ;;  %560 = vmatpush.bf16.msra.mxu3 %v1225_v49  ;;  %v1301_v45 = vld [vmem:[#allocation7 + $0x30] sm:$0xf]  ;;  %v1590_v49 = vld [vmem:[#allocation7 + $0xb4] sm:$0xf0]  ;;  %v1359_v5 = vld [vmem:[#allocation7 + $0xa8] sm:$0xf0] }
  0x40   :  { %v1302_v48 = vor.u32 %v1574_v46, %v1301_v45  ;;  %v1366_v52 = vor.u32 %v1590_v49, %v1365_v47  ;;  %v1349_v9 = vld [vmem:[#allocation7 + $0x90] sm:$0xf]  ;;  %v1586_v10 = vld [vmem:[#allocation7 + $0x94] sm:$0xf0]  ;;  %v1287_v13 = vld [vmem:[#allocation7 + $0x18] sm:$0xf0] }
  0x41   :  { %522 = vmatpush.bf16.msra.mxu0 %v1149_v53  ;;  %535 = vmatpush.bf16.msra.mxu1 %v1213_v54  ;;  %v1306_v53 = vor.u32 %v1573_v50, %v1303_v51  ;;  %v1589_v54 = vld [vmem:[#allocation7 + $0xb4] sm:$0xf]  ;;  %v1351_v16 = vld [vmem:[#allocation7 + $0x98] sm:$0xf0]  ;;  %v1277_v17 = vld [vmem:[#allocation7] sm:$0xf] }
  0x42   :  { %v1585_v14 = vld [vmem:[#allocation7 + $0x94] sm:$0xf]  ;;  %v1568_v18 = vld [vmem:[#allocation7 + $0x4] sm:$0xf0]  ;;  %v1341_v22 = vld [vmem:[#allocation7 + $0x80] sm:$0xf] }
  0x43   :  { %548 = vmatpush.bf16.msra.mxu2 %v1153_v58  ;;  %561 = vmatpush.bf16.msra.mxu3 %v1217_v62  ;;  %v1370_v58 = vor.u32 %v1589_v54, %v1367_v55  ;;  %v1294_v62 = vor.u32 %v1572_v60, %v1293_v59  ;;  %v1354_v21 = vor.u32 %v1585_v14, %v1351_v16  ;;  %v1584_v23 = vld [vmem:[#allocation7 + $0x84] sm:$0xf0]  ;;  %v1279_v27 = vld [vmem:[#allocation7 + $0x8] sm:$0xf0] }
  0x44   :  { %v1278_v31 = vor.u32 %v1568_v18, %v1277_v17  ;;  %v1603_v14 = vld [vmem:[%s2142_s6 + $0x20] sm:$0xff]  ;;  %v1602_v18 = vld [vmem:[%s2142_s6 + $0x18] sm:$0xff] }
  0x45   :  { %743 = vmatpush.bf16.msrb.mxu0 %v1334_v63  ;;  %756 = vmatpush.bf16.msrb.mxu1 %v1398_v3  ;;  %v1588_v63 = vld [vmem:[#allocation7 + $0xa4] sm:$0xf0]  ;;  %v1298_v3 = vor.u32 %v1571_v0, %v1295_v1  ;;  %v1614_v0 = vld [vmem:[%s2142_s6 + $0x78] sm:$0xff] }
  0x46   :  { %v1358_v2 = vor.u32 %v1588_v63, %v1357_v61  ;;  %v1622_v1 = vld [vmem:[%s2143_s7 + $0x38] sm:$0xff] }
  0x47   :  { %769 = vmatpush.bf16.msrb.mxu2 %v1338_v7  ;;  %782 = vmatpush.bf16.msrb.mxu3 %v1402_v8  ;;  %v1362_v7 = vor.u32 %v1587_v4, %v1359_v5  ;;  %v1570_v8 = vld [vmem:[#allocation7 + $0x14] sm:$0xf0] }
  0x48   :  { %v1286_v11 = vor.u32 %v1570_v8, %v1285_v6  ;;  %v1605_v6 = vld [vmem:[%s2142_s6 + $0x30] sm:$0xff] }
  0x49   :  { %744 = vmatpush.bf16.msrb.mxu0 %v1326_v12  ;;  %757 = vmatpush.bf16.msrb.mxu1 %v1390_v15  ;;  %v1569_v12 = vld [vmem:[#allocation7 + $0x14] sm:$0xf]  ;;  %v1350_v15 = vor.u32 %v1586_v10, %v1349_v9  ;;  %v1621_v8 = vld [vmem:[%s2143_s7 + $0x30] sm:$0xff] }
  0x4a   :  { %v1604_v10 = vld [vmem:[%s2142_s6 + $0x28] sm:$0xff] }
  0x4b   :  { %770 = vmatpush.bf16.msrb.mxu2 %v1330_v19  ;;  %783 = vmatpush.bf16.msrb.mxu3 %v1394_v20  ;;  %v1290_v20 = vor.u32 %v1569_v12, %v1287_v13 }
  0x4d   :  { %745 = vmatpush.bf16.msrb.mxu0 %v1318_v24  ;;  %758 = vmatpush.bf16.msrb.mxu1 %v1382_v28  ;;  %v1567_v24 = vld [vmem:[#allocation7 + $0x4] sm:$0xf] }
  0x4e   :  { %v1583_v28 = vld [vmem:[#allocation7 + $0x84] sm:$0xf]  ;;  %v1282_v33 = vor.u32 %v1567_v24, %v1279_v27  ;;  %v1629_v24 = vld [vmem:[%s2143_s7 + $0x70] sm:$0xff]  ;;  %v1599_v27 = vld [vmem:[%s2142_s6] sm:$0xff] }
  0x4f   :  { %771 = vmatpush.bf16.msrb.mxu2 %v1322_v29  ;;  %784 = vmatpush.bf16.msrb.mxu3 %v1386_v32  ;;  %v1343_v29 = vld [vmem:[#allocation7 + $0x88] sm:$0xf0]  ;;  %v1342_v32 = vor.u32 %v1584_v23, %v1341_v22  ;;  %v1620_v22 = vld [vmem:[%s2143_s7 + $0x28] sm:$0xff] }
  0x50   :  { %v1346_v34 = vor.u32 %v1583_v28, %v1343_v29  ;;  %v1600_v23 = vld [vmem:[%s2142_s6 + $0x8] sm:$0xff] }
  0x51   :  { %746 = vmatpush.bf16.msrb.mxu0 %v1310_v35  ;;  %759 = vmatpush.bf16.msrb.mxu1 %v1374_v39  ;;  %v257_v35 = vld [vmem:[%s2144_s8] ss:$4 sm:$0xf] }
  0x52   :  { %v259_v37 = vperm.slane %v257_v35, 0  ;;  %v260_v40 = vperm.slane %v257_v35, 1  ;;  %v261_v51 = vperm.slane %v257_v35, 2  ;;  %v1628_v28 = vld [vmem:[%s2143_s7 + $0x68] sm:$0xff] }
  0x53   :  { %772 = vmatpush.bf16.msrb.mxu2 %v1314_v43  ;;  %785 = vmatpush.bf16.msrb.mxu3 %v1378_v44  ;;  %v1608_v29 = vld [vmem:[%s2142_s6 + $0x48] sm:$0xff] }
  0x55   :  { %747 = vmatpush.bf16.msrb.mxu0 %v1302_v48  ;;  %760 = vmatpush.bf16.msrb.mxu1 %v1366_v52 }
  0x57   :  { %773 = vmatpush.bf16.msrb.mxu2 %v1306_v53  ;;  %786 = vmatpush.bf16.msrb.mxu3 %v1370_v58  ;;  %v262_v53 = vperm.slane %v257_v35, 3  ;;  %v1616_v35 = vld [vmem:[%s2143_s7 + $0x8] sm:$0xff] }
  0x59   :  { %748 = vmatpush.bf16.msrb.mxu0 %v1294_v62  ;;  %761 = vmatpush.bf16.msrb.mxu1 %v1358_v2 }
  0x5b   :  { %774 = vmatpush.bf16.msrb.mxu2 %v1298_v3  ;;  %787 = vmatpush.bf16.msrb.mxu3 %v1362_v7  ;;  %v1613_v7 = vld [vmem:[%s2142_s6 + $0x70] sm:$0xff] }
  0x5d   :  { %749 = vmatpush.bf16.msrb.mxu0 %v1286_v11  ;;  %762 = vmatpush.bf16.msrb.mxu1 %v1350_v15  ;;  %v1612_v11 = vld [vmem:[%s2142_s6 + $0x68] sm:$0xff]  ;;  %v1611_v15 = vld [vmem:[%s2142_s6 + $0x60] sm:$0xff] }
  0x5f   :  { %775 = vmatpush.bf16.msrb.mxu2 %v1290_v20  ;;  %788 = vmatpush.bf16.msrb.mxu3 %v1354_v21  ;;  %v1630_v20 = vld [vmem:[%s2143_s7 + $0x78] sm:$0xff] }
  0x60   :  { %v1610_v21 = vld [vmem:[%s2142_s6 + $0x58] sm:$0xff] }
  0x61   :  { %750 = vmatpush.bf16.msrb.mxu0 %v1278_v31  ;;  %763 = vmatpush.bf16.msrb.mxu1 %v1342_v32  ;;  %v1627_v31 = vld [vmem:[%s2143_s7 + $0x60] sm:$0xff] }
  0x62   :  { %v1607_v32 = vld [vmem:[%s2142_s6 + $0x40] sm:$0xff] }
  0x63   :  { %776 = vmatpush.bf16.msrb.mxu2 %v1282_v33  ;;  %789 = vmatpush.bf16.msrb.mxu3 %v1346_v34  ;;  %v1617_v33 = vld [vmem:[%s2143_s7 + $0x10] sm:$0xff]  ;;  %v1626_v34 = vld [vmem:[%s2143_s7 + $0x58] sm:$0xff] }
  0x9d   :  { %v2019_v56 = vpop.f32.mrf.mxu0  ;;  %v2021_v57 = vpop.f32.mrf.mxu1 }
  0xa5   :  { %v155_v19 = vpop.f32.mrf.mxu2  ;;  %v168_v25 = vpop.f32.mrf.mxu3 }
  0xa6   :  { %v131_v26 = vpop.f32.mrf.mxu0  ;;  %v144_v30 = vpop.f32.mrf.mxu1 }
  0xa7   :  { %v1619_v26 = vld [vmem:[%s2143_s7 + $0x20] sm:$0xff]  ;;  %v1618_v30 = vld [vmem:[%s2143_s7 + $0x18] sm:$0xff] }
  0xad   :  { %v157_v36 = vpop.f32.mrf.mxu2  ;;  %v170_v38 = vpop.f32.mrf.mxu3 }
  0xae   :  { %v214_v39 = vpop.f32.mrf.mxu0  ;;  %v227_v42 = vpop.f32.mrf.mxu1  ;;  %v1625_v36 = vld [vmem:[%s2143_s7 + $0x50] sm:$0xff]  ;;  %v1624_v38 = vld [vmem:[%s2143_s7 + $0x48] sm:$0xff] }
  0xaf   :  { %v215_v41 = vadd.f32 %v214_v39, %v2019_v56  ;;  %v228_v43 = vadd.f32 %v227_v42, %v2021_v57  ;;  %v1606_v57 = vld [vmem:[%s2142_s6 + $0x38] sm:$0xff]  ;;  %v1145_v39 = vld [vmem:[%s2144_s8 + $0x1] ss:$4 sm:$0x3] }
  0xb1   :  { %v267_v44 = vadd.f32 %v259_v37, %v215_v41  ;;  %v268_v45 = vadd.f32 %v260_v40, %v228_v43  ;;  %v1615_v37 = vld [vmem:[%s2143_s7] sm:$0xff]  ;;  %v344_v41 = vperm.slane %v1145_v39, 0 }
  0xb2   :  { %v1623_v40 = vld [vmem:[%s2143_s7 + $0x40] sm:$0xff] }
  0xb3   :  { %v271_v46 = vmax.f32 %v267_v44, 0.0  ;;  %v272_v47 = vmax.f32 %v268_v45, 0.0 }
  0xb5   :  { %v240_v48 = vpop.f32.mrf.mxu2  ;;  %v275_v49 = vpack.c.bf16 %v272_v47, %v271_v46  ;;  %v253_v52 = vpop.f32.mrf.mxu3  ;;  %v345_v46 = vperm.slane %v1145_v39, 1 }
  0xb6   :  { %v241_v50 = vadd.f32 %v240_v48, %v155_v19  ;;  %v216_v54 = vpop.f32.mrf.mxu0  ;;  %v254_v55 = vadd.f32 %v253_v52, %v168_v25  ;;  %v229_v58 = vpop.f32.mrf.mxu1  ;;  %v1601_v19 = vld [vmem:[%s2142_s6 + $0x10] sm:$0xff] }
  0xb7   :  { %v349_v59 = vunpack.c.l.b16 %v275_v49  ;;  %v350_v60 = vunpack.c.h.b16 %v275_v49  ;;  %v1609_v25 = vld [vmem:[%s2142_s6 + $0x50] sm:$0xff] }
  0xb8   :  { %v269_v61 = vadd.f32 %v261_v51, %v241_v50  ;;  %v270_v56 = vadd.f32 %v262_v53, %v254_v55  ;;  %v1274_v55 = vld [vmem:[%s2144_s8 + $0x9] ss:$4 sm:$0x3] }
  0xb9   :  { %v351_v62 = vpack.c.b16 %v349_v59, %v349_v59  ;;  %v352_v63 = vpack.c.b16 %v350_v60, %v350_v60  ;;  %v572_v59 = vperm.slane %v1274_v55, 0 }
  0xba   :  { %v273_v3 = vmax.f32 %v269_v61, 0.0  ;;  %v274_v4 = vmax.f32 %v270_v56, 0.0 }
  0xbb   :  { %523 = vmatmul.bf16.vlgmr.msra.gmra.mxu0 %v351_v62  ;;  %536 = vmatmul.bf16.vlgmr.msra.gmra.mxu1 %v352_v63 }
  0xbc   :  { %549 = vmatmul.bf16.vlgmr.msra.gmra.mxu2 %v351_v62  ;;  %562 = vmatmul.bf16.vlgmr.msra.gmra.mxu3 %v352_v63  ;;  %v276_v9 = vpack.c.bf16 %v274_v4, %v273_v3 }
  0xbd   :  { %v242_v2 = vpop.f32.mrf.mxu2  ;;  %v255_v5 = vpop.f32.mrf.mxu3  ;;  %1083 = vmatpush.bf16.msra.mxu2 %v1606_v57  ;;  %1096 = vmatpush.bf16.msra.mxu3 %v1614_v0 }
  0xbe   :  { %961 = vmatpush.bf16.msra.mxu0 %v1622_v1  ;;  %v577_v12 = vunpack.c.l.b16 %v276_v9  ;;  %v578_v13 = vunpack.c.h.b16 %v276_v9  ;;  %974 = vmatpush.bf16.msra.mxu1 %v1630_v20  ;;  %v573_v1 = vperm.slane %v1274_v55, 1 }
  0xc0   :  { %v579_v16 = vpack.c.b16 %v577_v12, %v577_v12  ;;  %v580_v17 = vpack.c.b16 %v578_v13, %v578_v13 }
  0xc1   :  { %1084 = vmatpush.bf16.msra.mxu2 %v1605_v6  ;;  %1097 = vmatpush.bf16.msra.mxu3 %v1613_v7 }
  0xc2   :  { %962 = vmatpush.bf16.msra.mxu0 %v1621_v8  ;;  %975 = vmatpush.bf16.msra.mxu1 %v1629_v24 }
  0xc5   :  { %1085 = vmatpush.bf16.msra.mxu2 %v1604_v10  ;;  %1098 = vmatpush.bf16.msra.mxu3 %v1612_v11 }
  0xc6   :  { %963 = vmatpush.bf16.msra.mxu0 %v1620_v22  ;;  %976 = vmatpush.bf16.msra.mxu1 %v1628_v28 }
  0xc9   :  { %1086 = vmatpush.bf16.msra.mxu2 %v1603_v14  ;;  %1099 = vmatpush.bf16.msra.mxu3 %v1611_v15 }
  0xca   :  { %964 = vmatpush.bf16.msra.mxu0 %v1619_v26  ;;  %977 = vmatpush.bf16.msra.mxu1 %v1627_v31 }
  0xcb   :  { %751 = vmatmul.bf16.vlgmr.msrb.gmra.mxu0 %v579_v16  ;;  %764 = vmatmul.bf16.vlgmr.msrb.gmra.mxu1 %v580_v17 }
  0xcc   :  { %777 = vmatmul.bf16.vlgmr.msrb.gmra.mxu2 %v579_v16  ;;  %790 = vmatmul.bf16.vlgmr.msrb.gmra.mxu3 %v580_v17 }
  0xcd   :  { %1087 = vmatpush.bf16.msra.mxu2 %v1602_v18  ;;  %1100 = vmatpush.bf16.msra.mxu3 %v1610_v21 }
  0xce   :  { %965 = vmatpush.bf16.msra.mxu0 %v1618_v30  ;;  %978 = vmatpush.bf16.msra.mxu1 %v1626_v34 }
  0xd1   :  { %1088 = vmatpush.bf16.msra.mxu2 %v1601_v19  ;;  %1101 = vmatpush.bf16.msra.mxu3 %v1609_v25 }
  0xd2   :  { %966 = vmatpush.bf16.msra.mxu0 %v1617_v33  ;;  %979 = vmatpush.bf16.msra.mxu1 %v1625_v36 }
  0xd5   :  { %1089 = vmatpush.bf16.msra.mxu2 %v1600_v23  ;;  %1102 = vmatpush.bf16.msra.mxu3 %v1608_v29  ;;  %v1639_v23 = vld [vmem:[%s2144_s8 + $0x2] ss:$0 sm:$0xff] }
  0xd6   :  { %967 = vmatpush.bf16.msra.mxu0 %v1616_v35  ;;  %980 = vmatpush.bf16.msra.mxu1 %v1624_v38 }
  0xd9   :  { %1090 = vmatpush.bf16.msra.mxu2 %v1599_v27  ;;  %1103 = vmatpush.bf16.msra.mxu3 %v1607_v32 }
  0xda   :  { %968 = vmatpush.bf16.msra.mxu0 %v1615_v37  ;;  %981 = vmatpush.bf16.msra.mxu1 %v1623_v40 }
 0x138   :  { %v524_v42 = vpop.f32.mrf.mxu0  ;;  %v537_v43 = vpop.f32.mrf.mxu1 }
 0x139   :  { %v525_v44 = vadd.f32 %v524_v42, %v344_v41 }
 0x13b   :  { %v538_v45 = vadd.f32 %v537_v43, %v525_v44 }
 0x13d   :  { %v567_v47 = vmax.f32 %v538_v45, 0.0 }
 0x13f   :  { %v797_v48 = vpack.c.bf16 %v567_v47, %v567_v47  ;;  %v550_v49 = vpop.f32.mrf.mxu2  ;;  %v563_v50 = vpop.f32.mrf.mxu3 }
 0x140   :  { %v551_v51 = vadd.f32 %v550_v49, %v345_v46  ;;  %v526_v52 = vpop.f32.mrf.mxu0  ;;  %v539_v53 = vpop.f32.mrf.mxu1 }
 0x141   :  { %1091 = vmatmul.bf16.vlgmr.msra.gmra.mxu2 %v797_v48 }
 0x142   :  { %v564_v54 = vadd.f32 %v563_v50, %v551_v51 }
 0x144   :  { %v568_v58 = vmax.f32 %v564_v54, 0.0 }
 0x146   :  { %v798_v60 = vpack.c.bf16 %v568_v58, %v568_v58 }
 0x147   :  { %v552_v61 = vpop.f32.mrf.mxu2  ;;  %v565_v56 = vpop.f32.mrf.mxu3 }
 0x148   :  { %1104 = vmatmul.bf16.vlgmr.msra.gmra.mxu3 %v798_v60  ;;  %v752_v62 = vpop.f32.mrf.mxu0  ;;  %v765_v63 = vpop.f32.mrf.mxu1 }
 0x149   :  { %v753_v57 = vadd.f32 %v752_v62, %v572_v59 }
 0x14b   :  { %v766_v0 = vadd.f32 %v765_v63, %v753_v57 }
 0x14d   :  { %v795_v2 = vmax.f32 %v766_v0, 0.0 }
 0x14f   :  { %v831_v3 = vpack.c.bf16 %v795_v2, %v795_v2  ;;  %v778_v4 = vpop.f32.mrf.mxu2  ;;  %v791_v5 = vpop.f32.mrf.mxu3 }
 0x150   :  { %v779_v6 = vadd.f32 %v778_v4, %v573_v1  ;;  %v754_v7 = vpop.f32.mrf.mxu0  ;;  %v767_v8 = vpop.f32.mrf.mxu1 }
 0x151   :  { %969 = vmatmul.bf16.vlgmr.msra.gmra.mxu0 %v831_v3 }
 0x152   :  { %v792_v9 = vadd.f32 %v791_v5, %v779_v6 }
 0x154   :  { %v796_v10 = vmax.f32 %v792_v9, 0.0 }
 0x156   :  { %v832_v11 = vpack.c.bf16 %v796_v10, %v796_v10 }
 0x157   :  { %v780_v12 = vpop.f32.mrf.mxu2  ;;  %v793_v13 = vpop.f32.mrf.mxu3 }
 0x158   :  { %982 = vmatmul.bf16.vlgmr.msra.gmra.mxu1 %v832_v11 }
 0x1c4   :  { %v1092_v14 = vpop.f32.mrf.mxu2 }
 0x1cb   :  { %v1105_v15 = vpop.f32.mrf.mxu3 }
 0x1cc   :  { %v1094_v16 = vpop.f32.mrf.mxu2 }
 0x1ce   :  { %v970_v17 = vpop.f32.mrf.mxu0 }
 0x1d3   :  { %v1107_v18 = vpop.f32.mrf.mxu3 }
 0x1d5   :  { %v983_v19 = vpop.f32.mrf.mxu1 }
 0x1d6   :  { %v984_v20 = vadd.f32 %v983_v19, %v970_v17  ;;  %v972_v21 = vpop.f32.mrf.mxu0 }
 0x1d8   :  { %v1093_v22 = vadd.f32 %v1092_v14, %v984_v20 }
 0x1da   :  { %v1106_v24 = vadd.f32 %v1105_v15, %v1093_v22 }
 0x1dc   :  { %v1111_v25 = vadd.f32 %v1639_v23, %v1106_v24 }
 0x1dd   :  { %v985_v26 = vpop.f32.mrf.mxu1 }
 0x1de   :  { %1113 = vst.msk [vmem:[%s2145_s9] sm:$0xff] %vm1112_vm4, %v1111_v25 }
 0x1df   :  { %1118 = vsyncpa [#allocation3], 1 }
 0x1e0   :  { %1119 = vsyncpa [#allocation5], 1 }
 0x1e1   :  { %1120 = vsyncpa [#allocation8], 1 }

</bundles_post_ra>
